<compile_context>
chip_gen: v7x
topology: tpu7x:2x2x1
jax: 0.10.0
libtpu: 0.0.40
codegen_flags: <defaults>
</compile_context>

<pallas_src>
import functools

import jax
import jax.numpy as jnp
from jax.experimental import pallas as pl
from jax.experimental.pallas import tpu as pltpu

BN_EPS = 1e-5          # PyTorch BatchNorm1d default eps
LANE = 128             # TPU lane width — feature dims are padded to this


def _ceil_to(x, m):
    return ((x + m - 1) // m) * m


def _divisors(n):
    return [d for d in range(1, n + 1) if n % d == 0]


# --------------------------------------------------------------------------
# Generation-aware VMEM / tile sizing
# --------------------------------------------------------------------------
@functools.lru_cache(maxsize=None)
def _vmem_limit_bytes():
    cap = 128 * 1024 * 1024
    try:
        info = pltpu.get_tpu_info()
        c = getattr(info, "vmem_capacity_bytes", None)
        if c:
            cap = int(c)
    except Exception:
        pass
    if cap <= 64 * 1024 * 1024:                     # v7x-class (64 MiB / TC)
        lim = cap - 24 * 1024 * 1024
    else:                                           # v5e / v6e (128 MiB)
        lim = min(cap - 32 * 1024 * 1024, 100 * 1024 * 1024)
    return max(lim, 24 * 1024 * 1024)


def _pick_tiles(B, N, din, dout, opad, x_isz, adj_isz):
    """Pick (block_b, block_n) budgeting every pipelined tile + intermediates."""
    budget = int(_vmem_limit_bytes() * 0.9)

    def cost(bb, bn):
        tiles = (bb * N * din * x_isz            # xin (full node rows)
                 + bb * bn * N * adj_isz         # adjacency row tile
                 + bb * bn * dout * x_isz        # z writeback tile
                 + 2 * bb * bn * opad * 4)       # fc accumulator in + out (f32)
        weights = (din * dout + din * opad) * x_isz + 4 * (dout + opad + 2 * din)
        interm = bb * N * din * 4 + bb * bn * (2 * din + dout + opad) * 4
        return 2 * (tiles + weights) + interm    # x2: double-buffered pipeline

    row_cands = sorted([d for d in _divisors(N) if d % 8 == 0], reverse=True)
    bn = next((d for d in row_cands if cost(1, d) <= budget), row_cands[-1])
    fitting = [d for d in _divisors(B) if cost(d, bn) <= budget]
    if not fitting:
        return 1, bn
    # Smallest batch tile that still fills the MXU M dimension (>=512 rows);
    # otherwise the largest tile that fits the VMEM budget.
    big = [d for d in fitting if d * bn >= 512]
    return (min(big) if big else max(fitting)), bn


def _grid_cparams():
    return pltpu.CompilerParams(
        dimension_semantics=("parallel", "parallel"),
        vmem_limit_bytes=_vmem_limit_bytes())


# --------------------------------------------------------------------------
# Pallas kernels
# --------------------------------------------------------------------------
def _gin_stage_kernel(*refs, gin_eps, activate_input, use_relu):
    """One GIN stage on one (batch tile, node-row tile).

    If activate_input: h_l = act(z_{l-1} * scale + shift)   (fused BN + ReLU)
    else (layer 0):    h_l = xin                            (raw features)
    fc_out = [fc_acc +] h_l @ Wfc_l                          (in-place FC acc)
    z_l    = [(1+eps) h_l + A h_l] @ W_l + b_l               (pre-BN output)
    stats  = per-tile [sum(z_l), sum((z_l - tile_mean)^2)]   (BN partials)
    """
    if activate_input:
        (xin_ref, adj_ref, w_ref, b_ref, scale_ref, shift_ref,
         wfc_ref, fcacc_ref, z_ref, fcout_ref, stat_ref) = refs
    else:
        (xin_ref, adj_ref, w_ref, b_ref, wfc_ref,
         z_ref, fcout_ref, stat_ref) = refs
        scale_ref = shift_ref = fcacc_ref = None

    cdt = xin_ref.dtype
    tb, n_full, din = xin_ref.shape
    bn = adj_ref.shape[1]
    dout = w_ref.shape[1]
    opad = wfc_ref.shape[1]

    def activate(v):
        h = v.astype(jnp.float32)
        if activate_input:
            h = h * scale_ref[...] + shift_ref[...]
            if use_relu:
                h = jnp.maximum(h, 0.0)
        return h

    # Full-row representation (contraction operand of A @ h).
    h_full_f = activate(xin_ref[...])
    h_full_c = h_full_f.astype(cdt) if activate_input else xin_ref[...]

    # Rows owned by this grid step along the node axis.
    if bn == n_full:
        hr_f, hr_c = h_full_f, h_full_c
    else:
        row0 = pl.multiple_of(pl.program_id(1) * bn, bn)
        x_rows = xin_ref[:, pl.ds(row0, bn), :]
        hr_f = activate(x_rows)
        hr_c = hr_f.astype(cdt) if activate_input else x_rows

    # FC-head contribution of this stage's representation (never materializes
    # concat(h_0..h_L) in HBM).  Layer 0 writes directly, no accumulator read.
    fc = jnp.dot(hr_c.reshape(tb * bn, din), wfc_ref[...],
                 preferred_element_type=jnp.float32).reshape(tb, bn, opad)
    if fcacc_ref is not None:
        fc = fcacc_ref[...] + fc
    fcout_ref[...] = fc.astype(fcout_ref.dtype)

    # GIN aggregation: (1+eps) h + A h   (adjacency row tile x full h).
    neigh = jnp.einsum("bij,bjd->bid", adj_ref[...], h_full_c,
                       preferred_element_type=jnp.float32)
    agg = (1.0 + gin_eps) * hr_f + neigh

    # Linear layer as one flattened MXU matmul (f32 accumulation).
    z = jnp.dot(agg.astype(cdt).reshape(tb * bn, din), w_ref[...],
                preferred_element_type=jnp.float32) + b_ref[...]

    # BatchNorm partials: tile sum + sum of squared deviations from the tile
    # mean (stable Chan/Welford merge across tiles happens on the host).
    inv_rows = 1.0 / (tb * bn)
    s1 = jnp.sum(z, axis=0, keepdims=True)                   # (1, dout)
    d = z - s1 * inv_rows
    m2 = jnp.sum(d * d, axis=0, keepdims=True)               # (1, dout)
    stat_ref[...] = jnp.concatenate([s1, m2], axis=0)[None, None]

    z_ref[...] = z.reshape(tb, bn, dout).astype(z_ref.dtype)


def _gin_final_kernel(zin_ref, scale_ref, shift_ref, wfc_ref, bfc_ref,
                      fcacc_ref, out_ref, *, use_relu):
    """Final stage: activate the last pre-BN z and finish the FC projection."""
    h = zin_ref[...].astype(jnp.float32) * scale_ref[...] + shift_ref[...]
    if use_relu:
        h = jnp.maximum(h, 0.0)
    tb, bn, din = h.shape
    opad = wfc_ref.shape[1]
    fc = jnp.dot(h.astype(zin_ref.dtype).reshape(tb * bn, din), wfc_ref[...],
                 preferred_element_type=jnp.float32)
    out_ref[...] = (fcacc_ref[...] + fc.reshape(tb, bn, opad) + bfc_ref[...]
                    ).astype(out_ref.dtype)


# --------------------------------------------------------------------------
# pallas_call wrappers
# --------------------------------------------------------------------------
def _gin_stage_call(xin, adj, w, b, wfc, *, scale=None, shift=None,
                    fc_acc=None, gin_eps, use_relu, bb, bn):
    B, N, Din = xin.shape
    Dout = w.shape[1]
    Opad = wfc.shape[1]
    nb, nr = B // bb, N // bn
    activate_input = scale is not None

    in_specs = [
        pl.BlockSpec((bb, N, Din), lambda i, j: (i, 0, 0)),   # full node rows
        pl.BlockSpec((bb, bn, N), lambda i, j: (i, j, 0)),    # adjacency rows
        pl.BlockSpec((Din, Dout), lambda i, j: (0, 0)),
        pl.BlockSpec((1, Dout), lambda i, j: (0, 0)),
    ]
    args = [xin, adj, w, b]
    if activate_input:
        in_specs += [pl.BlockSpec((1, Din), lambda i, j: (0, 0)),
                     pl.BlockSpec((1, Din), lambda i, j: (0, 0))]
        args += [scale, shift]
    in_specs.append(pl.BlockSpec((Din, Opad), lambda i, j: (0, 0)))
    args.append(wfc)
    aliases = {}
    if activate_input:
        in_specs.append(pl.BlockSpec((bb, bn, Opad), lambda i, j: (i, j, 0)))
        args.append(fc_acc)
        aliases = {len(args) - 1: 1}       # fc accumulator updated in place

    kernel = functools.partial(_gin_stage_kernel, gin_eps=gin_eps,
                               activate_input=activate_input,
                               use_relu=use_relu)
    return pl.pallas_call(
        kernel,
        grid=(nb, nr),
        in_specs=in_specs,
        out_specs=[
            pl.BlockSpec((bb, bn, Dout), lambda i, j: (i, j, 0)),
            pl.BlockSpec((bb, bn, Opad), lambda i, j: (i, j, 0)),
            pl.BlockSpec((1, 1, 2, Dout), lambda i, j: (i, j, 0, 0)),
        ],
        out_shape=[
            jax.ShapeDtypeStruct((B, N, Dout), xin.dtype),      # pre-BN z_l
            jax.ShapeDtypeStruct((B, N, Opad), jnp.float32),    # FC accumulator
            jax.ShapeDtypeStruct((nb, nr, 2, Dout), jnp.float32),  # BN partials
        ],
        input_output_aliases=aliases,
        compiler_params=_grid_cparams(),
    )(*args)


def _gin_final_call(zin, scale, shift, wfc, bfc, fc_acc, *, use_relu, bb, bn):
    B, N, Din = zin.shape
    Opad = wfc.shape[1]
    nb, nr = B // bb, N // bn
    kernel = functools.partial(_gin_final_kernel, use_relu=use_relu)
    return pl.pallas_call(
        kernel,
        grid=(nb, nr),
        in_specs=[
            pl.BlockSpec((bb, bn, Din), lambda i, j: (i, j, 0)),
            pl.BlockSpec((1, Din), lambda i, j: (0, 0)),
            pl.BlockSpec((1, Din), lambda i, j: (0, 0)),
            pl.BlockSpec((Din, Opad), lambda i, j: (0, 0)),
            pl.BlockSpec((1, Opad), lambda i, j: (0, 0)),
            pl.BlockSpec((bb, bn, Opad), lambda i, j: (i, j, 0)),
        ],
        out_specs=pl.BlockSpec((bb, bn, Opad), lambda i, j: (i, j, 0)),
        out_shape=jax.ShapeDtypeStruct((B, N, Opad), jnp.float32),
        input_output_aliases={5: 0},       # finish FC in place on fc_acc
        compiler_params=_grid_cparams(),
    )(zin, scale, shift, wfc, bfc, fc_acc)


# --------------------------------------------------------------------------
# BatchNorm finalize (tiny per-channel math on partials, stable merge)
# --------------------------------------------------------------------------
def _bn_finalize(stats, gamma, beta, rows_per_tile, total_rows, batch_norm):
    dpad = gamma.shape[0]
    if not batch_norm:
        return (jnp.ones((1, dpad), jnp.float32),
                jnp.zeros((1, dpad), jnp.float32))
    st = stats.reshape(-1, 2, dpad)
    s1, m2 = st[:, 0, :], st[:, 1, :]
    mean = jnp.sum(s1, axis=0) / total_rows
    mean_t = s1 / rows_per_tile
    m2_tot = jnp.sum(m2, axis=0) + rows_per_tile * jnp.sum(
        jnp.square(mean_t - mean), axis=0)
    var = m2_tot / total_rows
    scale = gamma * jax.lax.rsqrt(var + BN_EPS)
    shift = beta - mean * scale
    return scale.reshape(1, -1), shift.reshape(1, -1)


# --------------------------------------------------------------------------
# Model: parameter init + forward (GIN semantics)
# --------------------------------------------------------------------------
def xavier_normal(key, out_dim, in_dim):
    std = (2.0 / (in_dim + out_dim)) ** 0.5
    return jax.random.normal(key, (out_dim, in_dim), jnp.float32) * std


def init_gin_params(key, node_feature_dim, hidden_dim, output_dim):
    """PyTorch-layout params + padded / pre-transposed f32 & bf16 kernel copies."""
    dims = [node_feature_dim] + list(hidden_dim)
    pdims = [_ceil_to(d, LANE) for d in dims]
    opad = _ceil_to(output_dim, LANE)
    num_layers = len(dims) - 1

    layers, raw_layers = [], []
    for l in range(num_layers):
        in_d, out_d = dims[l], dims[l + 1]
        pin, pout = pdims[l], pdims[l + 1]
        key, kw, kb = jax.random.split(key, 3)
        w = xavier_normal(kw, out_d, in_d)                       # (out, in)
        bound = 1.0 / (in_d ** 0.5)
        b = jax.random.uniform(kb, (out_d,), jnp.float32, -bound, bound)
        gamma = jnp.ones((out_d,), jnp.float32)
        beta = jnp.zeros((out_d,), jnp.float32)
        w_t = jnp.zeros((pin, pout), jnp.float32).at[:in_d, :out_d].set(w.T)
        layers.append({
            "w": w_t, "w_bf16": w_t.astype(jnp.bfloat16),
            "b": jnp.zeros((1, pout), jnp.float32).at[0, :out_d].set(b),
            # Padded gamma entries are 0 so padded channels stay exactly 0.
            "gamma": jnp.zeros((pout,), jnp.float32).at[:out_d].set(gamma),
            "beta": jnp.zeros((pout,), jnp.float32).at[:out_d].set(beta),
        })
        raw_layers.append((w, b, gamma, beta))

    sum_dim = sum(dims)
    key, kw, kb = jax.random.split(key, 3)
    fc_w = xavier_normal(kw, output_dim, sum_dim)                # (O, sum)
    bound = 1.0 / (sum_dim ** 0.5)
    fc_b = jax.random.uniform(kb, (output_dim,), jnp.float32, -bound, bound)

    fc_slices, off = [], 0
    for l in range(num_layers + 1):
        d, pd = dims[l], pdims[l]
        w_sl = fc_w[:, off:off + d]
        off += d
        w_pad = jnp.zeros((pd, opad), jnp.float32).at[:d, :output_dim].set(w_sl.T)
        fc_slices.append({"w": w_pad, "w_bf16": w_pad.astype(jnp.bfloat16)})
    fc_b_p = jnp.zeros((1, opad), jnp.float32).at[0, :output_dim].set(fc_b)

    return {
        "dims": dims, "pdims": pdims, "opad": opad, "output_dim": output_dim,
        "layers": layers, "fc_slices": fc_slices, "fc_b": fc_b_p,
        "raw": {"layers": raw_layers, "fc_w": fc_w, "fc_b": fc_b},
    }


def _wsel(entry, cdt):
    if cdt == jnp.bfloat16:
        return entry["w_bf16"]
    if cdt == jnp.float32:
        return entry["w"]
    return entry["w"].astype(cdt)


def gin_forward(params, x, adjacency, *, epsilon, batch_norm=True,
                activation="relu", compute_dtype=jnp.bfloat16,
                adj_dtype=jnp.bfloat16, block_b=None, block_n=None):
    """GIN forward.  compute_dtype=bf16 (default) feeds bf16 MXU operands with
    f32 accumulation; pass compute_dtype=jnp.float32 for an exact f32 path.
    adj_dtype=bf16 is exact for 0/1 adjacency matrices."""
    # TODO(synk): only 'relu' / None activations are implemented (the PyTorch
    # module allows any getattr(F, activation)).
    assert activation in ("relu", None)
    use_relu = activation == "relu"

    B, N, D0 = x.shape
    assert N % 8 == 0, "N must be a multiple of 8"
    # TODO(synk): ragged / zero-padded node counts would need row masking of
    # the BatchNorm statistics.

    dims, pdims, opad = params["dims"], params["pdims"], params["opad"]
    num_layers = len(dims) - 1
    assert num_layers >= 1
    cdt = jnp.dtype(compute_dtype) if compute_dtype is not None else x.dtype
    # TODO(synk): pass adj_dtype=None for weighted adjacency that needs f32.
    adt = jnp.dtype(adj_dtype) if adj_dtype is not None else cdt

    dmax = max(pdims)
    auto_bb, auto_bn = _pick_tiles(B, N, dmax, dmax, opad,
                                   jnp.dtype(cdt).itemsize,
                                   jnp.dtype(adt).itemsize)
    bb = block_b if block_b is not None else auto_bb
    bn = block_n if block_n is not None else auto_bn
    assert B % bb == 0
    assert N % bn == 0 and bn % 8 == 0

    xp = jnp.pad(x, ((0, 0), (0, 0), (0, pdims[0] - D0))).astype(cdt)
    adj = adjacency.astype(adt)

    rows_tile = bb * bn
    total_rows = B * N

    cur = xp
    scale = shift = fc_acc = None
    for l in range(num_layers):
        lay = params["layers"][l]
        z, fc_acc, stats = _gin_stage_call(
            cur, adj, _wsel(lay, cdt), lay["b"],
            _wsel(params["fc_slices"][l], cdt),
            scale=scale, shift=shift, fc_acc=fc_acc,
            gin_eps=epsilon, use_relu=use_relu, bb=bb, bn=bn)
        scale, shift = _bn_finalize(stats, lay["gamma"], lay["beta"],
                                    rows_tile, total_rows, batch_norm)
        cur = z

    out = _gin_final_call(cur, scale, shift,
                          _wsel(params["fc_slices"][num_layers], cdt),
                          params["fc_b"], fc_acc, use_relu=use_relu,
                          bb=bb, bn=bn)
    return out[..., :params["output_dim"]].astype(x.dtype)


# --------------------------------------------------------------------------
# Pure-JAX reference (for correctness check)
# --------------------------------------------------------------------------
def gin_forward_ref(params, x, adjacency, *, epsilon, batch_norm=True):
    h = [x]
    for (w, b, gamma, beta) in params["raw"]["layers"]:
        x = (1.0 + epsilon) * x + jnp.einsum("bij,bjd->bid", adjacency, x)
        z = jnp.einsum("bnd,dk->bnk", x, w.T) + b
        if batch_norm:
            B, N, d = z.shape
            z2 = z.reshape(B * N, d)
            mean = jnp.mean(z2, axis=0)
            var = jnp.mean((z2 - mean) ** 2, axis=0)
            z2 = (z2 - mean) * jax.lax.rsqrt(var + BN_EPS) * gamma + beta
            z = z2.reshape(B, N, d)
        x = jnp.maximum(z, 0.0)
        h.append(x)
    h = jnp.concatenate(h, axis=-1)
    return (jnp.einsum("bnd,dk->bnk", h, params["raw"]["fc_w"].T)
            + params["raw"]["fc_b"])


# --------------------------------------------------------------------------
if __name__ == "__main__":
    B, N = 2, 16
    node_feature_dim = 16
    hidden_dim = [32, 32]
    output_dim = 8
    epsilon = 0.1

    key = jax.random.PRNGKey(0)
    k_param, k_x, k_a = jax.random.split(key, 3)

    params = init_gin_params(k_param, node_feature_dim, hidden_dim, output_dim)

    x = jax.random.normal(k_x, (B, N, node_feature_dim), jnp.float32)
    adj_logits = jax.random.uniform(k_a, (B, N, N), jnp.float32)
    adjacency = (adj_logits > 0.5).astype(jnp.float32)
    adjacency = jnp.maximum(adjacency, jnp.transpose(adjacency, (0, 2, 1)))

    ref = gin_forward_ref(params, x, adjacency, epsilon=epsilon,
                          batch_norm=True)

    # f32 compute path, explicit small tiles -> grid (2, 2): exercises the
    # batch axis, the node-row axis and the in-place fc accumulation.
    out = gin_forward(params, x, adjacency, epsilon=epsilon, batch_norm=True,
                      activation="relu", compute_dtype=jnp.float32,
                      block_b=1, block_n=8)
    out = jax.block_until_ready(out)
    assert out.shape == (B, N, output_dim)
    assert jnp.allclose(out, ref, atol=1e-3, rtol=1e-3), "f32 mismatch vs ref"

    # Default bf16 MXU-operand path with auto tile sizes (looser tolerance:
    # activations / weights are rounded to bf16).
    out_bf16 = gin_forward(params, x, adjacency, epsilon=epsilon,
                           batch_norm=True, activation="relu")
    out_bf16 = jax.block_until_ready(out_bf16).astype(jnp.float32)
    rel = jnp.max(jnp.abs(out_bf16 - ref)) / (jnp.max(jnp.abs(ref)) + 1e-6)
    assert float(rel) < 0.1, "bf16 path diverged from reference"

    print("KERNEL_OK")
</pallas_src>

<mosaic_0001>
module attributes {stable_mosaic.version = 11 : i64} {
  func.func @_gin_stage_kernel(%arg0: i32, %arg1: i32, %arg2: memref<1x16x128xf32, #tpu.memory_space<vmem>>, %arg3: memref<1x8x16xbf16, #tpu.memory_space<vmem>>, %arg4: memref<128x128xf32, #tpu.memory_space<vmem>>, %arg5: memref<1x128xf32, #tpu.memory_space<vmem>>, %arg6: memref<128x128xf32, #tpu.memory_space<vmem>>, %arg7: memref<1x8x128xf32, #tpu.memory_space<vmem>>, %arg8: memref<1x8x128xf32, #tpu.memory_space<vmem>>, %arg9: memref<1x1x2x128xf32, #tpu.memory_space<vmem>>) attributes {dimension_semantics = [#tpu.dimension_semantics<parallel>, #tpu.dimension_semantics<parallel>], iteration_bounds = array<i64: 2, 2>, scalar_prefetch = 0 : i64, scratch_operands = 0 : i64, tpu.core_type = #tpu.core_type<tc>, window_params = [{transform_indices = @transform_0, window_bounds = array<i64: 1, 16, 128>}, {transform_indices = @transform_1, window_bounds = array<i64: 1, 8, 16>}, {pipeline_mode = #tpu.pipeline_mode<synchronous>, transform_indices = @transform_2, window_bounds = array<i64: 128, 128>}, {pipeline_mode = #tpu.pipeline_mode<synchronous>, transform_indices = @transform_3, window_bounds = array<i64: 1, 128>}, {pipeline_mode = #tpu.pipeline_mode<synchronous>, transform_indices = @transform_4, window_bounds = array<i64: 128, 128>}, {transform_indices = @transform_5, window_bounds = array<i64: 1, 8, 128>}, {transform_indices = @transform_6, window_bounds = array<i64: 1, 8, 128>}, {transform_indices = @transform_7, window_bounds = array<i64: 1, 1, 2, 128>}]} {
    %c0 = arith.constant 0 : index
    %c0_0 = arith.constant 0 : index
    %c0_1 = arith.constant 0 : index
    %0 = vector.load %arg2[%c0, %c0_0, %c0_1] : memref<1x16x128xf32, #tpu.memory_space<vmem>>, vector<1x16x128xf32>
    %c8_i32 = arith.constant 8 : i32
    %1 = arith.muli %arg1, %c8_i32 : i32
    %2 = tpu.assume_multiple %1, 8 : i32
    %c0_2 = arith.constant 0 : index
    %3 = arith.index_cast %2 : i32 to index
    %c0_3 = arith.constant 0 : index
    %4 = vector.load %arg2[%c0_2, %3, %c0_3] : memref<1x16x128xf32, #tpu.memory_space<vmem>>, vector<1x8x128xf32>
    %5 = vector.shape_cast %4 : vector<1x8x128xf32> to vector<8x128xf32>
    %c0_4 = arith.constant 0 : index
    %c0_5 = arith.constant 0 : index
    %6 = vector.load %arg6[%c0_4, %c0_5] : memref<128x128xf32, #tpu.memory_space<vmem>>, vector<128x128xf32>
    %cst = arith.constant dense<0.000000e+00> : vector<8x128xf32>
    %7 = tpu.matmul %5, %6, %cst {dimension_numbers = #tpu.dot_dimension_numbers<[1], [0], [0], [1], [0, 0, 1, 1], [], []>} : vector<8x128xf32>, vector<128x128xf32>, vector<8x128xf32> -> vector<8x128xf32>
    %8 = vector.shape_cast %7 : vector<8x128xf32> to vector<1x8x128xf32>
    %c0_6 = arith.constant 0 : index
    %c0_7 = arith.constant 0 : index
    %c0_8 = arith.constant 0 : index
    %9 = vector.load %arg8[%c0_6, %c0_7, %c0_8] : memref<1x8x128xf32, #tpu.memory_space<vmem>>, vector<1x8x128xf32>
    tpu.vector_store %arg8[%c0_6, %c0_7, %c0_8], %8 {strides = array<i32>} : memref<1x8x128xf32, #tpu.memory_space<vmem>>, vector<1x8x128xf32>,
    %c0_9 = arith.constant 0 : index
    %c0_10 = arith.constant 0 : index
    %c0_11 = arith.constant 0 : index
    %10 = vector.load %arg3[%c0_9, %c0_10, %c0_11] : memref<1x8x16xbf16, #tpu.memory_space<vmem>>, vector<1x8x16xbf16>
    "tpu.trace_start"() <{level = 10 : i32, message = "bij,bjd->bid"}> : () -> ()
    %cst_12 = arith.constant dense<0.000000e+00> : vector<1x8x128xf32>
    %11 = tpu.matmul %10, %0, %cst_12 {dimension_numbers = #tpu.dot_dimension_numbers<[2], [1], [1], [2], [0, 0, 0, 1, 1, 2], [0], [0]>} : vector<1x8x16xbf16>, vector<1x16x128xf32>, vector<1x8x128xf32> -> vector<1x8x128xf32>
    "tpu.trace_stop"() : () -> ()
    %cst_13 = arith.constant 1.100000e+00 : f32
    %12 = vector.broadcast %cst_13 : f32 to vector<1x8x128xf32>
    %13 = arith.mulf %12, %4 : vector<1x8x128xf32>
    %14 = arith.addf %13, %11 : vector<1x8x128xf32>
    %15 = vector.shape_cast %14 : vector<1x8x128xf32> to vector<8x128xf32>
    %c0_14 = arith.constant 0 : index
    %c0_15 = arith.constant 0 : index
    %16 = vector.load %arg4[%c0_14, %c0_15] : memref<128x128xf32, #tpu.memory_space<vmem>>, vector<128x128xf32>
    %cst_16 = arith.constant dense<0.000000e+00> : vector<8x128xf32>
    %17 = tpu.matmul %15, %16, %cst_16 {dimension_numbers = #tpu.dot_dimension_numbers<[1], [0], [0], [1], [0, 0, 1, 1], [], []>} : vector<8x128xf32>, vector<128x128xf32>, vector<8x128xf32> -> vector<8x128xf32>
    %c0_17 = arith.constant 0 : index
    %c0_18 = arith.constant 0 : index
    %18 = vector.load %arg5[%c0_17, %c0_18] : memref<1x128xf32, #tpu.memory_space<vmem>>, vector<1x128xf32>
    %19 = vector.broadcast %18 : vector<1x128xf32> to vector<8x128xf32>
    %20 = arith.addf %17, %19 : vector<8x128xf32>
    %cst_19 = arith.constant dense<0.000000e+00> : vector<128xf32>
    %21 = vector.multi_reduction <add>, %20, %cst_19 [0] : vector<8x128xf32> to vector<128xf32>
    %22 = vector.shape_cast %21 : vector<128xf32> to vector<1x128xf32>
    %cst_20 = arith.constant 1.250000e-01 : f32
    %23 = vector.broadcast %cst_20 : f32 to vector<1x128xf32>
    %24 = arith.mulf %22, %23 : vector<1x128xf32>
    %25 = vector.broadcast %24 : vector<1x128xf32> to vector<8x128xf32>
    %26 = arith.subf %20, %25 : vector<8x128xf32>
    %27 = arith.mulf %26, %26 : vector<8x128xf32>
    %cst_21 = arith.constant dense<0.000000e+00> : vector<128xf32>
    %28 = vector.multi_reduction <add>, %27, %cst_21 [0] : vector<8x128xf32> to vector<128xf32>
    %29 = vector.shape_cast %28 : vector<128xf32> to vector<1x128xf32>
    %30 = tpu.concatenate %22, %29 in 0 : vector<1x128xf32>, vector<1x128xf32> -> vector<2x128xf32>
    %31 = vector.shape_cast %30 : vector<2x128xf32> to vector<1x1x2x128xf32>
    %c0_22 = arith.constant 0 : index
    %c0_23 = arith.constant 0 : index
    %c0_24 = arith.constant 0 : index
    %c0_25 = arith.constant 0 : index
    %32 = vector.load %arg9[%c0_22, %c0_23, %c0_24, %c0_25] : memref<1x1x2x128xf32, #tpu.memory_space<vmem>>, vector<1x1x2x128xf32>
    tpu.vector_store %arg9[%c0_22, %c0_23, %c0_24, %c0_25], %31 {strides = array<i32>} : memref<1x1x2x128xf32, #tpu.memory_space<vmem>>, vector<1x1x2x128xf32>,
    %33 = vector.shape_cast %20 : vector<8x128xf32> to vector<1x8x128xf32>
    %c0_26 = arith.constant 0 : index
    %c0_27 = arith.constant 0 : index
    %c0_28 = arith.constant 0 : index
    %34 = vector.load %arg7[%c0_26, %c0_27, %c0_28] : memref<1x8x128xf32, #tpu.memory_space<vmem>>, vector<1x8x128xf32>
    tpu.vector_store %arg7[%c0_26, %c0_27, %c0_28], %33 {strides = array<i32>} : memref<1x8x128xf32, #tpu.memory_space<vmem>>, vector<1x8x128xf32>,
    return
  }
  func.func @transform_0(%arg0: i32, %arg1: i32) -> (i32, i32, i32) {
    %c0_i32 = arith.constant 0 : i32
    %c0_i32_0 = arith.constant 0 : i32
    %c0_i32_1 = arith.constant 0 : i32
    return %arg0, %c0_i32, %c0_i32_0 : i32, i32, i32
  }
  func.func @transform_1(%arg0: i32, %arg1: i32) -> (i32, i32, i32) {
    %c0_i32 = arith.constant 0 : i32
    %c0_i32_0 = arith.constant 0 : i32
    return %arg0, %arg1, %c0_i32 : i32, i32, i32
  }
  func.func @transform_2(%arg0: i32, %arg1: i32) -> (i32, i32) {
    %c0_i32 = arith.constant 0 : i32
    %c0_i32_0 = arith.constant 0 : i32
    %c0_i32_1 = arith.constant 0 : i32
    return %c0_i32, %c0_i32_0 : i32, i32
  }
  func.func @transform_3(%arg0: i32, %arg1: i32) -> (i32, i32) {
    %c0_i32 = arith.constant 0 : i32
    %c0_i32_0 = arith.constant 0 : i32
    %c0_i32_1 = arith.constant 0 : i32
    return %c0_i32, %c0_i32_0 : i32, i32
  }
  func.func @transform_4(%arg0: i32, %arg1: i32) -> (i32, i32) {
    %c0_i32 = arith.constant 0 : i32
    %c0_i32_0 = arith.constant 0 : i32
    %c0_i32_1 = arith.constant 0 : i32
    return %c0_i32, %c0_i32_0 : i32, i32
  }
  func.func @transform_5(%arg0: i32, %arg1: i32) -> (i32, i32, i32) {
    %c0_i32 = arith.constant 0 : i32
    %c0_i32_0 = arith.constant 0 : i32
    return %arg0, %arg1, %c0_i32 : i32, i32, i32
  }
  func.func @transform_6(%arg0: i32, %arg1: i32) -> (i32, i32, i32) {
    %c0_i32 = arith.constant 0 : i32
    %c0_i32_0 = arith.constant 0 : i32
    return %arg0, %arg1, %c0_i32 : i32, i32, i32
  }
  func.func @transform_7(%arg0: i32, %arg1: i32) -> (i32, i32, i32, i32) {
    %c0_i32 = arith.constant 0 : i32
    %c0_i32_0 = arith.constant 0 : i32
    %c0_i32_1 = arith.constant 0 : i32
    return %arg0, %arg1, %c0_i32, %c0_i32_0 : i32, i32, i32, i32
  }
}

</mosaic_0001>

<bundles_post_ra>
// kernel: tpu_custom_call.1
= control target key start
LH: loop header
LB: loop body
LE: loop exit
PB: predicated region body
PF: predicated region fallthrough
CT: control target
= control target key end

     0   :  { %s2195_s0 = inlined_call_operand.hbm [shape: f32[2,16,128], index: 0, kind: input, shape index: {}]   ;;  %s2196_s1 = inlined_call_operand.hbm [shape: bf16[2,16,16], index: 1, kind: input, shape index: {}]   ;;  %s2197_s2 = inlined_call_operand.hbm [shape: f32[128,128], index: 2, kind: input, shape index: {}]   ;;  %s2198_s3 = inlined_call_operand.hbm [shape: f32[1,128], index: 3, kind: input, shape index: {}]   ;;  %s2199_s4 = inlined_call_operand.hbm [shape: f32[128,128], index: 4, kind: input, shape index: {}]   ;;  %s2200_s5 = inlined_call_operand.hbm [shape: f32[2,16,128], index: 5, kind: output, shape index: {0}]   ;;  %s2201_s6 = inlined_call_operand.hbm [shape: f32[2,16,128], index: 6, kind: output, shape index: {1}]   ;;  %s2202_s7 = inlined_call_operand.hbm [shape: f32[2,2,2,128], index: 7, kind: output, shape index: {2}]  }
   0x1   :  { %2222 = sst [smem:[#allocation28_spill]] %s2195_s0 }
   0x2   :  { %2223 = sst [smem:[#allocation29_spill]] %s2197_s2 }
   0x3   :  { %2224 = sst [smem:[#allocation30_spill]] %s2198_s3 }
   0x4   :  { %2225 = sst [smem:[#allocation31_spill]] %s2199_s4 }
   0x5   :  { %2226 = sst [smem:[#allocation32_spill]] %s2200_s5 }
   0x6   :  { %2227 = sst [smem:[#allocation33_spill]] %s2201_s6 }
   0x7   :  { %2228 = sst [smem:[#allocation34_spill]] %s2202_s7 }
   0x8   :  { %13 = vsyncpa [#allocation3], 0 }
   0x9   :  { %15 = vsyncpa [#allocation3 + $0x1], 0 }
   0xa   :  { %16 = vsyncpa [#allocation6], 0 }
   0xb   :  { %18 = vsyncpa [#allocation6 + $0x1], 0 }
   0xc   :  { %19 = vsyncpa [#allocation9], 0 }
   0xd   :  { %20 = vsyncpa [#allocation4], 0 }
   0xe   :  { %22 = vsyncpa [#allocation4 + $0x1], 0 }
   0xf   :  { %23 = vsyncpa [#allocation13], 0 }
  0x10   :  { %25 = vsyncpa [#allocation13 + $0x1], 0  ;;  %s1707_s24 = smov 0   ;;  %s1709_s25 = smov 0  }
  0x11   :  { %s1711_s26 = smov 0   ;;  %s1713_s27 = smov 0  }
  0x12   :  { %s1715_s28 = smov 0   ;;  %s1717_s29 = smov 0  }
  0x13   :  { %s1719_s30 = smov 0   ;;  %s1721_s8 = smov 0  }
  0x14   :  { %s1723_s9 = smov 0   ;;  %s1725_s10 = smov 0  }
  0x15   :  { %s1727_s11 = smov 0  }
  0x16 LB: > { %2229 = sst [smem:[#allocation21_spill]] %s1612_s24  ;;  %s1761_s12 = sadd.s32 4294967295, %s1652_s11   ;;  %s1652_s11 = sphi %s1727_s11, %s31_s11   ;;  %s1648_s10 = sphi %s1725_s10, %s2282_s10   ;;  %s1644_s9 = sphi %s1723_s9, %s2281_s9   ;;  %s1640_s8 = sphi %s1721_s8, %s2280_s8   ;;  %s1636_s30 = sphi %s1719_s30, %s2279_s30   ;;  %s1632_s29 = sphi %s1717_s29, %s2278_s29   ;;  %s1628_s28 = sphi %s1715_s28, %s2277_s28   ;;  %s1624_s27 = sphi %s1713_s27, %s2276_s27   ;;  %s1620_s26 = sphi %s1711_s26, %s2275_s26   ;;  %s1616_s25 = sphi %s1709_s25, %s2274_s25   ;;  %s1612_s24 = sphi %s1707_s24, %s2273_s24  }
  0x17   : > { %2230 = sst [smem:[#allocation22_spill]] %s1636_s30  ;;  %p63_p0 = scmp.ne.s32.totalorder %s1628_s28, %s1624_s27 }
  0x18   : > { %2231 = sst [smem:[#allocation23_spill]] %s1640_s8  ;;  %p2204_p1 = scmp.eq.s32.totalorder %s1761_s12, 0 }
  0x19   : > { %p960_p2 = scmp.ge.s32.totalorder %s1652_s11, 1  ;;  %p249_p3 = scmp.lt.s32.totalorder %s1652_s11, 5 }
  0x1a   : > { %p1769_p4 = por %p2204_p1, %p63_p0  ;;  %s1654_s15 = smov [#allocation7]  }
  0x1b   : > { %p1773_p5 = pnand %p960_p2, %p249_p3  ;;  %s261_s16 = sshll.u32 %s1654_s15, 4  ;;  %s262_s16 = int_to_ptr.vmem [resolvable:$true] %s261_s16 }
  0x1c   : > { %s2232_s13 = scalar_select %p1769_p4, 1, 0 }
  0x1d   : > { %s2233_s14 = scalar_select %p1773_p5, 1, 0 }
  0x1e   : > { %p1183_p6 = pneg %p1773_p5  ;;  %s1655_s18 = smov [#allocation8]  }
  0x1f   : > { %s275_s19 = sshll.u32 %s1655_s18, 4  ;;  %s2235_s2 = sld [smem:[#allocation29_spill]]  ;;  %s1785_s19 = int_to_ptr.vmem [resolvable:$true] %s275_s19 }
  0x20   : > { %p1781_p7 = pnand %p1183_p6, %p2204_p1 }
  0x22   : > { %p1795_p9 = pneg %p1781_p7 }
  0x25   : > { %s1314_s22 = scalar_lea.hbm %s2235_s2, 2048 }
  0x26   : > { %p1315_p8 = scmp.ne.s32.totalorder %s2235_s2, %s1314_s22  ;;  %p1321_p12 = scmp.lt.u32.totalorder %s1314_s22, %s2235_s2 }
  0x28   : > { %p1317_p10 = pnand %p1795_p9, %p1315_p8 }
  0x2a   : > { %p1318_p11 = pneg %p1317_p10 }
  0x2c   : > { %p1323_p13 = pnand %p1321_p12, %p1318_p11 }
  0x2e   : > { %1326 = shalt.err (!%p1323_p13)
}
  0x2f   : > { %s1327_s20 = scalar_lea.vmem %s262_s16, 2048  ;;  %p1335_p6 = scmp.lt.s32.totalorder %s262_s16, %s262_s16 }
  0x30   : > { %p1328_p0 = scmp.ne.s32.totalorder %s262_s16, %s1327_s20  ;;  %p1336_p1 = scmp.lt.s32.totalorder %s1327_s20, %s1327_s20 }
  0x32   : > { %p1330_p2 = pnand %p1328_p0, %p1795_p9  ;;  %p1337_p4 = por %p1336_p1, %p1335_p6 }
  0x34   : > { %p1331_p3 = pneg %p1330_p2 }
  0x36   : > { %p1338_p5 = pnand %p1337_p4, %p1331_p3 }
  0x38   : > { %1341 = shalt.err (!%p1338_p5)
}
  0x39   : > { %s2210_s21 = smov 128   ;;  %s1657_s23 = smov 8  }
  0x3a   : > { %1186 = dma.hbm_to_vmem [thread:$0]  (!%p1781_p7), %s2235_s2, 2048, %s262_s16, [#allocation6], %s2210_s21, %s2210_s21, %s1657_s23  }
  0x3b   : > { %s2237_s3 = sld [smem:[#allocation30_spill]] }
  0x41   : > { %s1342_s5 = scalar_lea.hbm %s2237_s3, 16 }
  0x42   : > { %p1343_p1 = scmp.ne.s32.totalorder %s2237_s3, %s1342_s5  ;;  %p1349_p8 = scmp.lt.u32.totalorder %s1342_s5, %s2237_s3 }
  0x44   : > { %p1345_p4 = pnand %p1343_p1, %p1795_p9 }
  0x46   : > { %p1346_p5 = pneg %p1345_p4 }
  0x48   : > { %p1351_p10 = pnand %p1349_p8, %p1346_p5 }
  0x4a   : > { %1354 = shalt.err (!%p1351_p10)
}
  0x4b   : > { %s1355_s16 = scalar_lea.vmem %s1785_s19, 16  ;;  %s1362_s6 = scalar_lea.vmem %s1785_s19, 32 }
  0x4c   : > { %p1356_p11 = scmp.ne.s32.totalorder %s1785_s19, %s1355_s16  ;;  %p1363_p0 = scmp.lt.s32.totalorder %s1785_s19, %s1785_s19 }
  0x4d   : > { %p1364_p2 = scmp.lt.s32.totalorder %s1362_s6, %s1355_s16 }
  0x4e   : > { %p1358_p12 = pnand %p1356_p11, %p1795_p9 }
  0x4f   : > { %p1365_p3 = por %p1364_p2, %p1363_p0 }
  0x50   : > { %p1359_p13 = pneg %p1358_p12 }
  0x52   : > { %p1366_p6 = pnand %p1365_p3, %p1359_p13 }
  0x54   : > { %1369 = shalt.err (!%p1366_p6)
}
  0x55   : > { %1189 = dma.hbm_to_vmem [thread:$0]  (!%p1781_p7), %s2237_s3, 16, %s1785_s19, [#allocation9]  }
  0x56   : > { %s1658_s8 = smov [#allocation10]   ;;  %s2238_s4 = sld [smem:[#allocation31_spill]] }
  0x57   : > { %s285_s7 = sshll.u32 %s1658_s8, 4  ;;  %s286_s7 = int_to_ptr.vmem [resolvable:$true] %s285_s7 }
  0x5c   : > { %s1370_s18 = scalar_lea.hbm %s2238_s4, 2048 }
  0x5d   : > { %p1371_p1 = scmp.ne.s32.totalorder %s2238_s4, %s1370_s18  ;;  %p1377_p8 = scmp.lt.u32.totalorder %s1370_s18, %s2238_s4 }
  0x5f   : > { %p1373_p4 = pnand %p1371_p1, %p1795_p9 }
  0x61   : > { %p1374_p5 = pneg %p1373_p4 }
  0x63   : > { %p1379_p10 = pnand %p1377_p8, %p1374_p5 }
  0x65   : > { %1382 = shalt.err (!%p1379_p10)
}
  0x66   : > { %s1383_s19 = scalar_lea.vmem %s286_s7, 2048  ;;  %p1391_p0 = scmp.lt.s32.totalorder %s286_s7, %s286_s7 }
  0x67   : > { %p1384_p11 = scmp.ne.s32.totalorder %s286_s7, %s1383_s19  ;;  %p1392_p2 = scmp.lt.s32.totalorder %s1383_s19, %s1383_s19 }
  0x69   : > { %p1386_p12 = pnand %p1384_p11, %p1795_p9  ;;  %p1393_p3 = por %p1392_p2, %p1391_p0 }
  0x6b   : > { %p1387_p13 = pneg %p1386_p12 }
  0x6d   : > { %p1394_p6 = pnand %p1393_p3, %p1387_p13 }
  0x6f   : > { %1397 = shalt.err (!%p1394_p6)
}
  0x70   : > { %s2239_s5 = smov 128   ;;  %p180_p9 = scmp.eq.s32.totalorder %s1761_s12, 3 }
  0x71   : > { %1192 = dma.hbm_to_vmem [thread:$0]  (!%p1781_p7), %s2238_s4, 2048, %s286_s7, [#allocation9], %s2239_s5, %s2239_s5, %s1657_s23  }
  0x72   : > { %p57_p1 = scmp.ne.s32.totalorder %s1632_s29, %s1628_s28  ;;  %p2213_p4 = scmp.eq.s32.totalorder %s1652_s11, 0 }
  0x73   : > { %p2212_p5 = scmp.lt.s32.totalorder %s1652_s11, 4  ;;  %s299_s17 = sand.u32 1, %s1632_s29  }
  0x74   : > { %s994_s15 = sshll.u32 %s1648_s10, 8  ;;  %p59_p8 = por %p2213_p4, %p57_p1 }
  0x75   : > { %s965_s8 = sshll.u32 %s299_s17, 4  ;;  %s2240_s0 = sld [smem:[#allocation28_spill]] }
  0x76   : > { %p1875_p7 = pnand %p2212_p5, %p59_p8  ;;  %s303_s20 = scalar_lea.vmem [#allocation2], %s965_s8 }
  0x77   : > { %s310_s16 = sshll.u32 %s303_s20, 4  ;;  %s1881_s6 = scalar_lea.sflag [#allocation3], %s299_s17  ;;  %s1879_s16 = int_to_ptr.vmem [resolvable:$true] %s310_s16 }
  0x78   : > { %p1400_p11 = pneg %p1875_p7 }
  0x7b   : > { %s1871_s18 = scalar_lea.hbm %s2240_s0, %s994_s15  ;;  %s1403_s15 = scalar_lea.hbm %s2240_s0, 512 }
  0x7c   : > { %s1398_s19 = scalar_lea.hbm %s1871_s18, 256  ;;  %p1404_p0 = scmp.lt.u32.totalorder %s1871_s18, %s2240_s0 }
  0x7d   : > { %p1399_p10 = scmp.ne.s32.totalorder %s1871_s18, %s1398_s19  ;;  %p1405_p2 = scmp.lt.u32.totalorder %s1403_s15, %s1398_s19 }
  0x7e   : > { %p1407_p6 = scmp.lt.u32.totalorder %s1398_s19, %s1871_s18 }
  0x7f   : > { %p1401_p12 = pnand %p1400_p11, %p1399_p10  ;;  %p1406_p3 = por %p1405_p2, %p1404_p0 }
  0x81   : > { %p1402_p13 = pneg %p1401_p12  ;;  %p1408_p1 = por %p1407_p6, %p1406_p3 }
  0x83   : > { %p1409_p8 = pnand %p1408_p1, %p1402_p13 }
  0x85   : > { %1412 = shalt.err (!%p1409_p8)
}
  0x86   : > { %s1413_s17 = scalar_lea.vmem %s1879_s16, 256  ;;  %s1659_s8 = smov [#allocation2]  }
  0x87   : > { %p1414_p10 = scmp.ne.s32.totalorder %s1879_s16, %s1413_s17  ;;  %s1418_s20 = sshll.u32 %s1659_s8, 4  ;;  %s1419_s20 = int_to_ptr.vmem [resolvable:$false] %s1418_s20 }
  0x88   : > { %s1420_s21 = scalar_lea.vmem %s1419_s20, 512  ;;  %p1421_p4 = scmp.lt.s32.totalorder %s1879_s16, %s1419_s20 }
  0x89   : > { %p1416_p12 = pnand %p1414_p10, %p1400_p11  ;;  %p1422_p0 = scmp.lt.s32.totalorder %s1420_s21, %s1413_s17 }
  0x8b   : > { %p1417_p5 = pneg %p1416_p12  ;;  %p1423_p2 = por %p1422_p0, %p1421_p4 }
  0x8d   : > { %p1424_p3 = pnand %p1423_p2, %p1417_p5 }
  0x8f   : > { %1427 = shalt.err (!%p1424_p3)
}
  0x90   : > { %1196 = dma.hbm_to_vmem [thread:$0]  (!%p1875_p7), %s1871_s18, 256, %s1879_s16, %s1881_s6, %s2239_s5, %s2239_s5, %s1657_s23  }
  0x91   : > { %s50_s7 = sadd.s32 1, %s1632_s29  ;;  %s2214_s19 = sadd.s32 4294967294, %s1652_s11  }
  0x92   : > { %s40_s30 = sadd.s32 1, %s1644_s9  ;;  %s43_s15 = sadd.s32 1, %s1648_s10 }
  0x93   : > { %p41_p4 = scmp.ge.s32.totalorder %s40_s30, 2  ;;  %s78_s22 = sadd.s32 1, %s1620_s26 }
  0x94   : > { %p91_p5 = scmp.ne.s32.totalorder %s1616_s25, %s1612_s24  ;;  %p85_p11 = scmp.ne.s32.totalorder %s1620_s26, %s1616_s25 }
  0x95   : > { %s2284_s30 = smov (%p41_p4, %s40_s30), 0  ;;  %s2286_s15 = smov (!%p41_p4, %s43_s15), %s1648_s10 }
  0x96   : > { %2242 = sst [smem:[#allocation24_spill]] %s2284_s30  ;;  %s74_s27 = ssub.s32 %s1644_s9, %s2284_s30 }
  0x97   : > { %p45_p7 = scmp.ge.s32.totalorder %s2286_s15, 2  ;;  %p2243_p13 = scmp.eq.s32.totalorder %s1761_s12, 0 }
  0x98   : > { %p1934_p1 = por %p180_p9, %p85_p11  ;;  %p186_p8 = scmp.eq.s32.totalorder %s2214_s19, 3 }
  0x99   : > { %p1928_p6 = por %p91_p5, %p2243_p13  ;;  %s2288_s15 = smov (%p45_p7, %s2286_s15), 0 }
  0x9a   : > { %s2245_s5 = scalar_select %p1934_p1, 1, 0 }
  0x9b   : > { %2247 = sst [smem:[#allocation26_spill]] %s2288_s15  ;;  %p2248_p10 = scmp.eq.s32.totalorder %s1652_s11, 0 }
  0x9c   : > { %2246 = sst [smem:[#allocation25_spill]] %s2245_s5  ;;  %p1948_p0 = por %p186_p8, %p91_p5 }
  0x9d   : > { %p1944_p12 = por %p85_p11, %p2248_p10  ;;  %s47_s6 = ssub.s32 %s1648_s10, %s2288_s15 }
  0x9e   : > { %s2250_s16 = scalar_select %p1948_p0, 1, 0 }
  0x9f   : > { %s320_s17 = sand.u32 1, %s1652_s11   ;;  %p48_p9 = scmp.eq.s32.totalorder %s47_s6, 0 }
  0xa0   : > { %2251 = sst [smem:[#allocation27_spill]] %s2250_s16  ;;  %s75_s8 = sor.u32 %s74_s27, %s47_s6 }
  0xa1   : > { %p76_p2 = scmp.eq.s32.totalorder %s75_s8, 0  ;;  %s322_s20 = sand.u32 1, %s1620_s26  }
  0xa2   : > { %s1957_s21 = scalar_select %p48_p9, %s1632_s29, %s50_s7  }
  0xa3   : > { %s1960_s19 = scalar_select %p76_p2, %s1620_s26, %s78_s22  }
  0xa4   : > { %s968_s0 = sshll.u32 %s322_s20, 2  ;;  %s969_s2 = sshll.u32 %s1648_s10, 1 }
  0xa5   : > { %s329_s3 = sadd.s32 %s1644_s9, %s969_s2  ;;  %s324_s30 = scalar_lea.vmem [#allocation5], %s968_s0 }
  0xa6   : > { %s970_s4 = sshll.u32 %s329_s3, 6  ;;  %s333_s24 = sshll.u32 %s324_s30, 4  ;;  %s1969_s24 = int_to_ptr.vmem [resolvable:$true] %s333_s24 }
  0xa7   : > { %s1967_s15 = scalar_lea.hbm %s2196_s1, %s970_s4  ;;  %p2252_p3 = scmp.lt.s32.totalorder %s1652_s11, 4 }
  0xa8   : > { %s321_s0 = scalar_lea.sflag [#allocation6], %s320_s17  ;;  %s1428_s2 = scalar_lea.hbm %s1967_s15, 64 }
  0xa9   : > { %p1975_p4 = pnand %p2252_p3, %p1944_p12  ;;  %p1429_p5 = scmp.ne.s32.totalorder %s1967_s15, %s1428_s2 }
  0xaa   : > { %s1433_s30 = scalar_lea.hbm %s2196_s1, 256  ;;  %p1434_p8 = scmp.lt.u32.totalorder %s1967_s15, %s2196_s1 }
  0xab   : > { %p1430_p11 = pneg %p1975_p4  ;;  %p1435_p10 = scmp.lt.u32.totalorder %s1433_s30, %s1428_s2 }
  0xac   : > { %p1437_p9 = scmp.lt.u32.totalorder %s1428_s2, %s1967_s15 }
  0xad   : > { %p1431_p7 = pnand %p1430_p11, %p1429_p5  ;;  %p1436_p12 = por %p1435_p10, %p1434_p8 }
  0xaf   : > { %p1432_p13 = pneg %p1431_p7  ;;  %p1438_p2 = por %p1437_p9, %p1436_p12 }
  0xb1   : > { %p1439_p3 = pnand %p1438_p2, %p1432_p13 }
  0xb3   : > { %1442 = shalt.err (!%p1439_p3)
}
  0xb4   : > { %s1443_s5 = scalar_lea.vmem %s1969_s24, 64  ;;  %s1660_s18 = smov [#allocation5]  }
  0xb5   : > { %p1444_p5 = scmp.ne.s32.totalorder %s1969_s24, %s1443_s5  ;;  %s1448_s16 = sshll.u32 %s1660_s18, 4  ;;  %s1449_s16 = int_to_ptr.vmem [resolvable:$false] %s1448_s16 }
  0xb6   : > { %s1450_s6 = scalar_lea.vmem %s1449_s16, 128  ;;  %p1451_p1 = scmp.lt.s32.totalorder %s1969_s24, %s1449_s16 }
  0xb7   : > { %p1446_p7 = pnand %p1444_p5, %p1430_p11  ;;  %p1452_p8 = scmp.lt.s32.totalorder %s1450_s6, %s1443_s5 }
  0xb9   : > { %p1447_p0 = pneg %p1446_p7  ;;  %p1453_p10 = por %p1452_p8, %p1451_p1 }
  0xbb   : > { %p1454_p12 = pnand %p1453_p10, %p1447_p0 }
  0xbd   : > { %1457 = shalt.err (!%p1454_p12)
}
  0xbe   : > { %1199 = dma.hbm_to_vmem [thread:$0]  (!%p1975_p4), %s1967_s15, 64, %s1969_s24, %s321_s0  }
  0xbf   : > { %p2254_p13 = scmp.ne.s32.totalorder %s2233_s14, 0 }
  0xc0   : > { %s344_s17 = sand.u32 (!%p2254_p13), 1, %s1628_s28   ;;  %p2255_p11 = scmp.ne.s32.totalorder (!%p2254_p13), %s2232_s13, 0 }
  0xc1   : > { %342 = sbr.rel (%p2254_p13) target bundleno = 703 (0x2bf), region = 40  ;;  %s972_s8 = sshll.u32 (!%p2254_p13), %s344_s17, 4 }
  0xc2   : > { %s345_s20 = scalar_lea.sflag (!%p2254_p13), [#allocation3], %s344_s17  ;;  %s2007_s2 = scalar_lea.vmem (!%p2254_p13), [#allocation2], %s972_s8 }
  0xc8   : > { %1587 = dma.done.wait (%p2255_p11), %s345_s20, 256  }
  0xc9   : > { %1589 = vsyncadd (%p2255_p11), %s345_s20, 4294967040  ;;  %s353_s24 = sand.u32 1, %s1761_s12   ;;  %s2015_s15 = sand.u32 1, %s1616_s25  }
  0xca   : > { %s973_s14 = sshll.u32 %s2015_s15, 2  ;;  %s354_s7 = scalar_lea.sflag [#allocation6], %s353_s24 }
  0xcb   : > { %s357_s0 = scalar_lea.vmem [#allocation5], %s973_s14 }
  0xcc   : > { %1591 = dma.done.wait (%p1928_p6), %s354_s7, 64  }
  0xcd   : > { %1593 = vsyncadd (%p1928_p6), %s354_s7, 4294967232  ;;  %p2256_p1 = scmp.eq.s32.totalorder %s1761_s12, 0 }
  0xcf   : > { %1595 = dma.done.wait (%p2256_p1), [#allocation6], 2048   ;;  %p2257_p0 = pmov %p2256_p1 }
  0xd1   : > { %1597 = vsyncadd (%p2257_p0), [#allocation6], 4294965248  ;;  %p2258_p4 = pmov %p2257_p0 }
  0xd2   : > { %p2259_p9 = pmov %p2257_p0 }
  0xd3   : > { %1599 = dma.done.wait (%p2258_p4), [#allocation9], 2064  }
  0xd4   : > { %1601 = vsyncadd (%p2259_p9), [#allocation9], 4294965232  ;;  %v1661_v0 = vmov 0.0|0.0   ;;  %vm1662_vm0 = vmmov 0   ;;  %v1663_v1 = vmov 0.0   ;;  %v416_v2 = vld [vmem:[%s2007_s2] sm:$0xff] }
  0xd5   : > { %1134 = vmatprep.subr.bf16.mxu1 %v1661_v0  ;;  %1071 = vmatprep.mubr.msk.bf16.mxu1 %vm1662_vm0, %v1663_v1  ;;  %v417_v3 = vld [vmem:[%s2007_s2 + $0x8] sm:$0xff]  ;;  %v588_v6 = vld [vmem:[#allocation7 + $0x8] sm:$0xff]  ;;  %v508_v7 = vld [vmem:[%s357_s0] sm:$0xf]  ;;  %vm509_vm1 = vcmask 130048   ;;  %s2260_s13 = sld [smem:[#allocation22_spill]] }
  0xd6   : > { %1110 = vmatprep.subr.bf16.mxu0 %v1661_v0  ;;  %1064 = vmatprep.mubr.msk.f32.mxu0 %vm1662_vm0, %v1663_v1  ;;  %v1135_v4 = vpack.c.bf16 %v417_v3, %v416_v2  ;;  %v587_v5 = vld [vmem:[#allocation7] sm:$0xff]  ;;  %v589_v9 = vld [vmem:[#allocation7 + $0x10] sm:$0xff]  ;;  %v590_v10 = vld [vmem:[#allocation7 + $0x18] sm:$0xff]  ;;  %s2261_s3 = sld [smem:[#allocation23_spill]]  ;;  %s2262_s30 = sld [smem:[#allocation25_spill]] }
  0xd7   : > { %v1138_v8 = vpack.c.bf16 %v588_v6, %v587_v5  ;;  %v1141_v11 = vpack.c.bf16 %v590_v10, %v589_v9  ;;  %v591_v12 = vld [vmem:[#allocation7 + $0x20] sm:$0xff]  ;;  %v592_v13 = vld [vmem:[#allocation7 + $0x28] sm:$0xff]  ;;  %v593_v15 = vld [vmem:[#allocation7 + $0x30] sm:$0xff]  ;;  %s977_s22 = sshll.u32 %s2015_s15, 3  ;;  %s2263_s20 = sld [smem:[#allocation33_spill]] }
  0xd8   : > { %1136 = vmatpush3.bf16.msra.mxu1 %v1135_v4  ;;  %v1144_v14 = vpack.c.bf16 %v592_v13, %v591_v12  ;;  %v594_v16 = vld [vmem:[#allocation7 + $0x38] sm:$0xff]  ;;  %v595_v18 = vld [vmem:[#allocation7 + $0x40] sm:$0xff]  ;;  %v596_v19 = vld [vmem:[#allocation7 + $0x48] sm:$0xff]  ;;  %s407_s5 = scalar_lea.vmem [#allocation12], %s977_s22  ;;  %s2073_s14 = scalar_lea.sflag [#allocation13], %s353_s24 }
  0xd9   : > { %1137 = vmatprep.subr.bf16.mxu1 %v1661_v0  ;;  %v1147_v17 = vpack.c.bf16 %v594_v16, %v593_v15  ;;  %v1150_v20 = vpack.c.bf16 %v596_v19, %v595_v18  ;;  %v597_v21 = vld [vmem:[#allocation7 + $0x50] sm:$0xff]  ;;  %v598_v22 = vld [vmem:[#allocation7 + $0x58] sm:$0xff]  ;;  %v599_v24 = vld [vmem:[#allocation7 + $0x60] sm:$0xff]  ;;  %s740_s18 = sshll.u32 %s407_s5, 4  ;;  %s1664_s0 = smov [#allocation12]   ;;  %s2063_s18 = int_to_ptr.vmem [resolvable:$true] %s740_s18 }
  0xda   : > { %v1153_v23 = vpack.c.bf16 %v598_v22, %v597_v21  ;;  %v600_v25 = vld [vmem:[#allocation7 + $0x68] sm:$0xff]  ;;  %v601_v27 = vld [vmem:[#allocation7 + $0x70] sm:$0xff]  ;;  %v602_v28 = vld [vmem:[#allocation7 + $0x78] sm:$0xff]  ;;  %s1458_s7 = scalar_lea.vmem %s2063_s18, 128 }
  0xdb   : > { %1072 = vmatmul.mubr.msk.bf16.vlgmr.msra.gmra.mrb[0].mxu1 %vm509_vm1, %v508_v7  ;;  %v1156_v26 = vpack.c.bf16 %v600_v25, %v599_v24  ;;  %v1159_v29 = vpack.c.bf16 %v602_v28, %v601_v27  ;;  %v421_v30 = vld [vmem:[#allocation10] sm:$0xff]  ;;  %v422_v31 = vld [vmem:[#allocation10 + $0x8] sm:$0xff]  ;;  %v423_v33 = vld [vmem:[#allocation10 + $0x10] sm:$0xff]  ;;  %s980_s23 = sshll.u32 %s2260_s13, 3  ;;  %p1459_p6 = scmp.ne.s32.totalorder %s2063_s18, %s1458_s7 }
  0xdc   : > { %1139 = vmatpush3.bf16.msra.mxu1 %v1138_v8  ;;  %1107 = vmatprep.mubr.msk.f32.mxu1 %vm1662_vm0, %v1663_v1  ;;  %v1111_v32 = vpack.c.bf16 %v422_v31, %v421_v30  ;;  %v424_v34 = vld [vmem:[#allocation10 + $0x18] sm:$0xff]  ;;  %v425_v36 = vld [vmem:[#allocation10 + $0x20] sm:$0xff]  ;;  %v426_v37 = vld [vmem:[#allocation10 + $0x28] sm:$0xff]  ;;  %s419_s4 = scalar_lea.vmem %s2007_s2, %s980_s23 [#allocation2]  ;;  %s986_s27 = sshll.u32 %s2261_s3, 1 }
  0xdd   : > { %1140 = vmatprep.subr.bf16.mxu1 %v1661_v0  ;;  %v1114_v35 = vpack.c.bf16 %v424_v34, %v423_v33  ;;  %v1117_v38 = vpack.c.bf16 %v426_v37, %v425_v36  ;;  %v427_v39 = vld [vmem:[#allocation10 + $0x30] sm:$0xff]  ;;  %v428_v40 = vld [vmem:[#allocation10 + $0x38] sm:$0xff]  ;;  %v429_v42 = vld [vmem:[#allocation10 + $0x40] sm:$0xff]  ;;  %s2061_s16 = sadd.s32 %s2260_s13, %s986_s27  ;;  %p2264_p2 = scmp.ne.s32.totalorder %s2262_s30, 0 }
  0xde   : > { %1112 = vmatpush3.bf16.msra.mxu0 %v1111_v32  ;;  %v1120_v41 = vpack.c.bf16 %v428_v40, %v427_v39  ;;  %v430_v43 = vld [vmem:[#allocation10 + $0x48] sm:$0xff]  ;;  %v431_v45 = vld [vmem:[#allocation10 + $0x50] sm:$0xff]  ;;  %v432_v46 = vld [vmem:[#allocation10 + $0x58] sm:$0xff]  ;;  %s987_s6 = sshll.u32 %s2061_s16, 7  ;;  %s1462_s13 = sshll.u32 %s1664_s0, 4  ;;  %s1463_s13 = int_to_ptr.vmem [resolvable:$false] %s1462_s13 }
  0xdf   : > { %1113 = vmatprep.subr.bf16.mxu0 %v1661_v0  ;;  %v1123_v44 = vpack.c.bf16 %v430_v43, %v429_v42  ;;  %v1126_v47 = vpack.c.bf16 %v432_v46, %v431_v45  ;;  %v433_v48 = vld [vmem:[#allocation10 + $0x60] sm:$0xff]  ;;  %v434_v49 = vld [vmem:[#allocation10 + $0x68] sm:$0xff]  ;;  %v435_v51 = vld [vmem:[#allocation10 + $0x70] sm:$0xff]  ;;  %s738_s2 = scalar_lea.hbm %s2263_s20, %s987_s6  ;;  %p1460_p3 = pnand %p1459_p6, %p2264_p2 }
  0xe0   : > { %1142 = vmatpush3.bf16.msra.mxu1 %v1141_v11  ;;  %v1129_v50 = vpack.c.bf16 %v434_v49, %v433_v48  ;;  %v436_v52 = vld [vmem:[#allocation10 + $0x78] sm:$0xff]  ;;  %s1464_s23 = scalar_lea.vmem %s1463_s13, 256  ;;  %p1465_p7 = scmp.lt.s32.totalorder %s2063_s18, %s1463_s13 }
  0xe1   : > { %1143 = vmatprep.subr.bf16.mxu1 %v1661_v0  ;;  %v1132_v53 = vpack.c.bf16 %v436_v52, %v435_v51  ;;  %v420_v54 = vld [vmem:[%s419_s4] sm:$0xff]  ;;  %p1461_p5 = pneg %p1460_p3  ;;  %p1466_p8 = scmp.lt.s32.totalorder %s1464_s23, %s1458_s7 }
  0xe2   : > { %1115 = vmatpush3.bf16.msra.mxu0 %v1114_v35  ;;  %v585_v55 = vmul.f32 1.1, %v420_v54 }
  0xe3   : > { %1116 = vmatprep.subr.bf16.mxu0 %v1661_v0  ;;  %p1467_p10 = por %p1466_p8, %p1465_p7 }
  0xe4   : > { %1145 = vmatpush3.bf16.msra.mxu1 %v1144_v14 }
  0xe5   : > { %1146 = vmatprep.subr.bf16.mxu1 %v1661_v0  ;;  %p1468_p12 = pnand %p1467_p10, %p1461_p5 }
  0xe6   : > { %1118 = vmatpush3.bf16.msra.mxu0 %v1117_v38 }
  0xe7   : > { %1119 = vmatprep.subr.bf16.mxu0 %v1661_v0 }
  0xe8   : > { %1148 = vmatpush3.bf16.msra.mxu1 %v1147_v17 }
  0xe9   : > { %1149 = vmatprep.subr.bf16.mxu1 %v1661_v0 }
  0xea   : > { %1121 = vmatpush3.bf16.msra.mxu0 %v1120_v41 }
  0xeb   : > { %1122 = vmatprep.subr.bf16.mxu0 %v1661_v0 }
  0xec   : > { %1151 = vmatpush3.bf16.msra.mxu1 %v1150_v20 }
  0xed   : > { %1152 = vmatprep.subr.bf16.mxu1 %v1661_v0 }
  0xee   : > { %1124 = vmatpush3.bf16.msra.mxu0 %v1123_v44 }
  0xef   : > { %1125 = vmatprep.subr.bf16.mxu0 %v1661_v0 }
  0xf0   : > { %1154 = vmatpush3.bf16.msra.mxu1 %v1153_v23 }
  0xf1   : > { %1155 = vmatprep.subr.bf16.mxu1 %v1661_v0 }
  0xf2   : > { %1127 = vmatpush3.bf16.msra.mxu0 %v1126_v47 }
  0xf3   : > { %1128 = vmatprep.subr.bf16.mxu0 %v1661_v0 }
  0xf4   : > { %1157 = vmatpush3.bf16.msra.mxu1 %v1156_v26 }
  0xf5   : > { %1158 = vmatprep.subr.bf16.mxu1 %v1661_v0 }
  0xf6   : > { %1130 = vmatpush3.bf16.msra.mxu0 %v1129_v50 }
  0xf7   : > { %1131 = vmatprep.subr.bf16.mxu0 %v1661_v0 }
  0xf8   : > { %1160 = vmatpush3.bf16.msra.mxu1 %v1159_v29 }
  0xfa   : > { %1133 = vmatpush3.bf16.msra.mxu0 %v1132_v53 }
  0xfd   : > { %1065 = vmatmul.mubr.f32.vlgmr.msra.gmra.mrb[0].mxu0 %v420_v54 }
 0x1ae   : > { %v579_v56 = vpop.f32.mrb[0].mxu1 }
 0x1af   : > { %v586_v57 = vadd.f32 %v585_v55, %v579_v56  ;;  %v1073_v58 = vpop.f32.mrb[1].mxu1 }
 0x1b0   : > { %v582_v59 = vpop.f32.mrb[2].mxu1 }
 0x1b1   : > { %v1074_v60 = vpop.f32.mrb[3].mxu1  ;;  %1108 = vmatmul.mubr.f32.vlgmr.msra.gmra.mrb[4].mxu1 %v586_v57 }
 0x1d0   : > { %v503_v61 = vpop.f32.mrb[0].mxu0 }
 0x1d1   : > { %507 = vst [vmem:[%s407_s5] sm:$0xff] %v503_v61  ;;  %v1066_v62 = vpop.f32.mrb[1].mxu0 }
 0x1d2   : > { %1471 = shalt.err (!%p1468_p12)
}
 0x1d3   : > { %s1472_s3 = scalar_lea.hbm %s738_s2, 128  ;;  %s1476_s4 = scalar_lea.hbm %s2263_s20, 512 }
 0x1d4   : > { %p1473_p13 = scmp.ne.s32.totalorder %s738_s2, %s1472_s3  ;;  %p1477_p0 = scmp.lt.u32.totalorder %s738_s2, %s2263_s20 }
 0x1d5   : > { %p1478_p4 = scmp.lt.u32.totalorder %s1476_s4, %s1472_s3  ;;  %p1480_p6 = scmp.lt.u32.totalorder %s1472_s3, %s738_s2 }
 0x1d6   : > { %p1474_p11 = pnand %p1473_p13, %p2264_p2 }
 0x1d7   : > { %p1479_p9 = por %p1478_p4, %p1477_p0 }
 0x1d8   : > { %p1475_p1 = pneg %p1474_p11 }
 0x1d9   : > { %p1481_p3 = por %p1480_p6, %p1479_p9 }
 0x1db   : > { %p1482_p5 = pnand %p1481_p3, %p1475_p1 }
 0x1dd   : > { %1485 = shalt.err (!%p1482_p5)
}
 0x1de   : > { %1178 = dma.vmem_to_hbm [thread:$0]  (%p2264_p2), %s2063_s18, 128, %s738_s2, %s2073_s14   ;;  %v982_v63 = vld [vmem:[#allocation8] ss:$0 sm:$0xff] }
 0x1df   : > { %s400_s17 = scalar_lea.vmem [#allocation11], %s977_s22  ;;  %s2265_s13 = sld [smem:[#allocation32_spill]] }
 0x1e0   : > { %s725_s8 = sshll.u32 %s400_s17, 4  ;;  %s700_s18 = scalar_lea.sflag [#allocation4], %s2015_s15  ;;  %s2101_s8 = int_to_ptr.vmem [resolvable:$true] %s725_s8 }
 0x1e1   : > { %s1486_s2 = scalar_lea.vmem %s2101_s8, 128  ;;  %s1665_s22 = smov [#allocation11]  }
 0x1e2   : > { %p1487_p7 = scmp.ne.s32.totalorder %s2101_s8, %s1486_s2  ;;  %s1490_s3 = sshll.u32 %s1665_s22, 4  ;;  %s1491_s3 = int_to_ptr.vmem [resolvable:$false] %s1490_s3 }
 0x1e3   : > { %s1492_s12 = scalar_lea.vmem %s1491_s3, 256  ;;  %p1493_p12 = scmp.lt.s32.totalorder %s2101_s8, %s1491_s3 }
 0x1e4   : > { %p1488_p8 = pnand %p1487_p7, %p2264_p2  ;;  %p1494_p13 = scmp.lt.s32.totalorder %s1492_s12, %s1486_s2 }
 0x1e5   : > { %s2099_s23 = scalar_lea.hbm %s2265_s13, %s987_s6 }
 0x1e6   : > { %p1489_p10 = pneg %p1488_p8  ;;  %p1495_p11 = por %p1494_p13, %p1493_p12 }
 0x1e8   : > { %p1496_p1 = pnand %p1495_p11, %p1489_p10 }
 0x284   : > { %v676_v0 = vpop.f32.mrb[4].mxu1 }
 0x285   : > { %v677_v1 = vadd.f32 %v982_v63, %v676_v0  ;;  %v1109_v2 = vpop.f32.mrb[5].mxu1 }
 0x287   : > { %v680_v3 = vrot.slane %v677_v1, 4  ;;  %698 = vst [vmem:[%s400_s17] sm:$0xff] %v677_v1 }
 0x288   : > { %1499 = shalt.err (!%p1496_p1)
}
 0x289   : > { %s1500_s6 = scalar_lea.hbm %s2099_s23, 128  ;;  %s1504_s27 = scalar_lea.hbm %s2265_s13, 512 }
 0x28a   : > { %p1501_p0 = scmp.ne.s32.totalorder %s2099_s23, %s1500_s6  ;;  %p1505_p6 = scmp.lt.u32.totalorder %s2099_s23, %s2265_s13 }
 0x28b   : > { %p1506_p3 = scmp.lt.u32.totalorder %s1504_s27, %s1500_s6  ;;  %p1508_p7 = scmp.lt.u32.totalorder %s1500_s6, %s2099_s23 }
 0x28c   : > { %p1502_p4 = pnand %p1501_p0, %p2264_p2 }
 0x28d   : > { %p1507_p5 = por %p1506_p3, %p1505_p6 }
 0x28e   : > { %p1503_p9 = pneg %p1502_p4 }
 0x28f   : > { %p1509_p8 = por %p1508_p7, %p1507_p5 }
 0x291   : > { %p1510_p10 = pnand %p1509_p8, %p1503_p9 }
 0x293   : > { %1513 = shalt.err (!%p1510_p10)
}
 0x294   : > { %1177 = dma.vmem_to_hbm [thread:$0]  (%p2264_p2), %s2101_s8, 128, %s2099_s23, %s700_s18   ;;  %v681_v4 = vadd.f32 %v680_v3, %v677_v1  ;;  %vm695_vm2 = vcmask 1040384  }
 0x295   : > { %s979_s7 = sshll.u32 %s2015_s15, 1  ;;  %s991_s0 = sshll.u32 %s2061_s16, 5 }
 0x296   : > { %v682_v5 = vrot.slane %v681_v4, 2  ;;  %s414_s2 = scalar_lea.vmem [#allocation14], %s979_s7  ;;  %s2266_s18 = sld [smem:[#allocation34_spill]] }
 0x297   : > { %s755_s22 = sshll.u32 %s414_s2, 4  ;;  %s1666_s16 = smov [#allocation14]   ;;  %s2132_s22 = int_to_ptr.vmem [resolvable:$true] %s755_s22 }
 0x298   : > { %v683_v6 = vadd.f32 %v682_v5, %v681_v4  ;;  %s1514_s15 = scalar_lea.vmem %s2132_s22, 32  ;;  %s1518_s12 = sshll.u32 %s1666_s16, 4  ;;  %s1519_s12 = int_to_ptr.vmem [resolvable:$false] %s1518_s12 }
 0x299   : > { %p1515_p12 = scmp.ne.s32.totalorder %s2132_s22, %s1514_s15  ;;  %s1520_s6 = scalar_lea.vmem %s1519_s12, 64 }
 0x29a   : > { %v684_v7 = vrot.slane %v683_v6, 1  ;;  %p1521_p1 = scmp.lt.s32.totalorder %s2132_s22, %s1519_s12  ;;  %p1522_p0 = scmp.lt.s32.totalorder %s1520_s6, %s1514_s15 }
 0x29b   : > { %p1516_p13 = pnand %p1515_p12, %p2264_p2 }
 0x29c   : > { %v685_v8 = vadd.f32 %v684_v7, %v683_v6  ;;  %s2130_s3 = scalar_lea.hbm %s2266_s18, %s991_s0  ;;  %p1523_p4 = por %p1522_p0, %p1521_p1 }
 0x29d   : > { %p1517_p11 = pneg %p1516_p13 }
 0x29e   : > { %v686_v9 = vmul.f32 0.125, %v685_v8 }
 0x29f   : > { %p1524_p9 = pnand %p1523_p4, %p1517_p11 }
 0x2a0   : > { %v687_v10 = vsub.f32 %v677_v1, %v686_v9 }
 0x2a2   : > { %v688_v11 = vmul.f32 %v687_v10, %v687_v10 }
 0x2a4   : > { %v689_v12 = vrot.slane %v688_v11, 4 }
 0x2a6   : > { %v690_v13 = vadd.f32 %v689_v12, %v688_v11 }
 0x2a8   : > { %v691_v14 = vrot.slane %v690_v13, 2 }
 0x2aa   : > { %v692_v15 = vadd.f32 %v691_v14, %v690_v13 }
 0x2ac   : > { %v693_v16 = vrot.slane %v692_v15, 1 }
 0x2ae   : > { %v694_v17 = vadd.f32 %v693_v16, %v692_v15 }
 0x2b0   : > { %v696_v18 = vsel %vm695_vm2, %v685_v8, %v694_v17 }
 0x2b1   : > { %697 = vst [vmem:[%s414_s2] sm:$0x3] %v696_v18 }
 0x2b2   : > { %1527 = shalt.err (!%p1524_p9)
}
 0x2b3   : > { %s1528_s24 = scalar_lea.hbm %s2130_s3, 32  ;;  %s1532_s5 = scalar_lea.hbm %s2266_s18, 128 }
 0x2b4   : > { %p1529_p6 = scmp.ne.s32.totalorder %s2130_s3, %s1528_s24  ;;  %p1533_p7 = scmp.lt.u32.totalorder %s2130_s3, %s2266_s18 }
 0x2b5   : > { %p1534_p8 = scmp.lt.u32.totalorder %s1532_s5, %s1528_s24  ;;  %p1536_p12 = scmp.lt.u32.totalorder %s1528_s24, %s2130_s3 }
 0x2b6   : > { %p1530_p3 = pnand %p1529_p6, %p2264_p2 }
 0x2b7   : > { %p1535_p10 = por %p1534_p8, %p1533_p7 }
 0x2b8   : > { %p1531_p5 = pneg %p1530_p3 }
 0x2b9   : > { %p1537_p13 = por %p1536_p12, %p1535_p10 }
 0x2bb   : > { %p1538_p11 = pnand %p1537_p13, %p1531_p5 }
 0x2bd   : > { %1541 = shalt.err (!%p1538_p11)
}
 0x2be   : > { %1179 = dma.vmem_to_hbm [thread:$0]  (%p2264_p2), %s2132_s22, 32, %s2130_s3, %s2073_s14  }
 0x2bf PF: > { %s2267_s0 = sld [smem:[#allocation21_spill]]  ;;  %s2268_s2 = sld [smem:[#allocation27_spill]] }
 0x2c0   : > { %p1217_p1 = scmp.ge.s32.totalorder %s1652_s11, 2 }
 0x2c5   : > { %s767_s8 = sand.u32 1, %s2267_s0   ;;  %p2269_p0 = scmp.ne.s32.totalorder %s2268_s2, 0 }
 0x2c6   : > { %s768_s23 = scalar_lea.sflag [#allocation4], %s767_s8 }
 0x2c7   : > { %p1201_p4 = pnand %p1217_p1, %p2269_p0 }
 0x2c9   : > { %1603 = dma.done.wait (!%p1201_p4), %s768_s23, 128  }
 0x2ca   : > { %1605 = vsyncadd (!%p1201_p4), %s768_s23, 4294967168  ;;  %s2270_s15 = sadd.s32 4294967294, %s1652_s11  }
 0x2cb   : > { %s776_s16 = sand.u32 1, %s2270_s15  }
 0x2cc   : > { %s777_s12 = scalar_lea.sflag [#allocation13], %s776_s16 }
 0x2cd   : > { %1607 = dma.done.wait (!%p1201_p4), %s777_s12, 160  }
 0x2ce   : > { %1609 = vsyncadd (!%p1201_p4), %s777_s12, 4294967136  ;;  %s31_s11 = sadd.s32 1, %s1652_s11   ;;  %s2271_s14 = sld [smem:[#allocation24_spill]] }
 0x2cf   : > { %p28_p2 = scmp.ge.s32.totalorder %s31_s11, 6   ;;  %s2272_s22 = sld [smem:[#allocation26_spill]] }
 0x2d0   : > { %s2273_s24 = smov %s1616_s25  ;;  %s2274_s25 = smov %s1620_s26 }
 0x2d1   : > { %s2275_s26 = smov %s1960_s19  ;;  %s2276_s27 = smov %s1628_s28 }
 0x2d2   : > { %s2277_s28 = smov %s1632_s29  ;;  %s2278_s29 = smov %s1957_s21 }
 0x2d3   : > { %s2279_s30 = smov %s1644_s9  ;;  %s2280_s8 = smov %s1648_s10 }
 0x2d4   : > { %s2281_s9 = smov %s2271_s14  ;;  %30 = sbr.rel (!%p28_p2) target bundleno = 22 (0x16), region = 143 }
 0x2d5   : > { %s2282_s10 = smov %s2272_s22 }
 0x2db   :  { %791 = vsyncpa [#allocation3], 1 }
 0x2dc   :  { %793 = vsyncpa [#allocation3 + $0x1], 1 }
 0x2dd   :  { %794 = vsyncpa [#allocation6], 1 }
 0x2de   :  { %796 = vsyncpa [#allocation6 + $0x1], 1 }
 0x2df   :  { %797 = vsyncpa [#allocation9], 1 }
 0x2e0   :  { %798 = vsyncpa [#allocation4], 1 }
 0x2e1   :  { %800 = vsyncpa [#allocation4 + $0x1], 1 }
 0x2e2   :  { %801 = vsyncpa [#allocation13], 1 }
 0x2e3   :  { %803 = vsyncpa [#allocation13 + $0x1], 1 }

</bundles_post_ra>
